<compile_context>
chip_gen: v7x
topology: tpu7x:2x2x1
jax: 0.10.0
libtpu: 0.0.40
codegen_flags: <defaults>
</compile_context>

<pallas_src>
import functools
import math

import jax
import jax.numpy as jnp
from jax import lax
from jax.experimental import pallas as pl
from jax.experimental.pallas import tpu as pltpu

_LANE = 128


def _cosine_distance_kernel(x1_ref, x2_ref, o_ref, *, eps):
    # x1_ref / x2_ref blocks: (bn, C, T), T a multiple of 128 (lane-dense).
    # o_ref block: (bn, 1, T).
    # Reduction / accumulation in f32 regardless of input dtype.
    x1 = x1_ref[...].astype(jnp.float32)
    x2 = x2_ref[...].astype(jnp.float32)

    dot = jnp.sum(x1 * x2, axis=1, keepdims=True)    # (bn, 1, T)
    n1sq = jnp.sum(x1 * x1, axis=1, keepdims=True)   # (bn, 1, T)
    n2sq = jnp.sum(x2 * x2, axis=1, keepdims=True)   # (bn, 1, T)

    # PyTorch: x1.x2 / max(||x1||*||x2||, eps)  ==  x1.x2 * rsqrt(max(||x1||^2*||x2||^2, eps^2))
    eps2 = jnp.float32(eps) * jnp.float32(eps)
    inv = lax.rsqrt(jnp.maximum(n1sq * n2sq, eps2))
    o_ref[...] = (jnp.float32(1.0) - dot * inv).astype(o_ref.dtype)


def _round_up(x, m):
    return ((x + m - 1) // m) * m


def cosine_distance(x1, x2, *, eps: float = 1e-8, block_spatial=None,
                    vmem_limit_bytes: int = 48 << 20):
    """1 - cosine_similarity(x1, x2, dim=1, eps). Inputs (N, C, *spatial)."""
    assert x1.shape == x2.shape, "shapes must match (no broadcasting)"
    assert x1.ndim >= 2, "need at least (N, C)"
    N, C = x1.shape[0], x1.shape[1]
    spatial = x1.shape[2:]
    HW = int(math.prod(spatial)) if spatial else 1
    out_dtype = jnp.result_type(x1.dtype, x2.dtype)  # match PyTorch's output dtype
    out_shape_final = (N,) + tuple(spatial)

    # Flatten spatial dims so the minor (lane) axis is H*W (or 1 for rank-2 inputs).
    x1f = x1.reshape(N, C, HW)
    x2f = x2.reshape(N, C, HW)

    itemsize = jnp.dtype(x1.dtype).itemsize
    total_bytes = 2 * N * C * HW * itemsize

    # Tile selection.
    tiny = total_bytes <= (2 << 20)  # whole problem comfortably fits in one block
    if tiny:
        bn = N                        # single grid step over N: no pipeline overhead
        T = _round_up(HW, _LANE)
    else:
        bn = 1
        if block_spatial is None:
            # Per-element VMEM cost: 2 inputs x 2 pipeline buffers x itemsize,
            # plus ~3 block-sized f32 temporaries from the in-kernel f32 cast.
            # 16 MiB budget keeps us well under the scoped-VMEM defaults.
            per_elem = 2 * 2 * itemsize + 3 * 4
            budget = 16 << 20
            T = budget // max(1, C * per_elem)
            T = max(_LANE, (T // _LANE) * _LANE)
            T = min(T, 2048)
        else:
            T = _round_up(block_spatial, _LANE)
        T = min(T, _round_up(HW, _LANE))

    # Pad the flattened spatial axis so the grid tiles it exactly with full-width
    # (multiple-of-128) blocks. Padded lanes produce a value of 1.0 and are sliced
    # off below, so correctness is unaffected.
    HW_pad = _round_up(HW, T)
    if HW_pad != HW:
        pad = HW_pad - HW
        x1f = jnp.pad(x1f, ((0, 0), (0, 0), (0, pad)))
        x2f = jnp.pad(x2f, ((0, 0), (0, 0), (0, pad)))

    grid = (N // bn, HW_pad // T)

    kernel = functools.partial(_cosine_distance_kernel, eps=eps)
    out = pl.pallas_call(
        kernel,
        # 3-D output so the last-two block dims (1, T) always satisfy the
        # (8, 128)-or-full-dim rule, independent of bn.
        out_shape=jax.ShapeDtypeStruct((N, 1, HW_pad), out_dtype),
        grid_spec=pltpu.PrefetchScalarGridSpec(
            num_scalar_prefetch=0,
            grid=grid,
            in_specs=[
                pl.BlockSpec((bn, C, T), lambda i, j: (i, 0, j)),
                pl.BlockSpec((bn, C, T), lambda i, j: (i, 0, j)),
            ],
            out_specs=pl.BlockSpec((bn, 1, T), lambda i, j: (i, 0, j)),
        ),
        compiler_params=pltpu.CompilerParams(
            # Two independent axes -> both TensorCores usable on v7x even for
            # small N (the spatial-tile axis is also parallel).
            dimension_semantics=("parallel", "parallel"),
            vmem_limit_bytes=vmem_limit_bytes,
        ),
    )(x1f, x2f)

    return out[:, 0, :HW].reshape(out_shape_final)


def _reference(x1, x2, eps=1e-8):
    x1 = x1.astype(jnp.float32)
    x2 = x2.astype(jnp.float32)
    dot = jnp.sum(x1 * x2, axis=1)
    n1sq = jnp.sum(x1 * x1, axis=1)
    n2sq = jnp.sum(x2 * x2, axis=1)
    denom = jnp.maximum(jnp.sqrt(n1sq * n2sq), eps)
    return 1.0 - dot / denom


if __name__ == "__main__":
    key = jax.random.PRNGKey(0)
    k1, k2 = jax.random.split(key)
    N, C, H, W = 2, 4, 16, 16
    x1 = jax.random.normal(k1, (N, C, H, W), dtype=jnp.float32)
    x2 = jax.random.normal(k2, (N, C, H, W), dtype=jnp.float32)

    out = jax.block_until_ready(cosine_distance(x1, x2))

    ref = _reference(x1, x2)
    assert out.shape == (N, H, W)
    assert out.dtype == ref.dtype
    assert jnp.allclose(out, ref, atol=1e-5, rtol=1e-5)
    print("KERNEL_OK")
</pallas_src>

<mosaic_0001>
module attributes {stable_mosaic.version = 11 : i64} {
  func.func @_cosine_distance_kernel(%arg0: i32, %arg1: i32, %arg2: memref<2x4x256xf32, #tpu.memory_space<vmem>>, %arg3: memref<2x4x256xf32, #tpu.memory_space<vmem>>, %arg4: memref<2x1x256xf32, #tpu.memory_space<vmem>>) attributes {dimension_semantics = [#tpu.dimension_semantics<parallel>, #tpu.dimension_semantics<parallel>], iteration_bounds = array<i64: 1, 1>, scalar_prefetch = 0 : i64, scratch_operands = 0 : i64, tpu.core_type = #tpu.core_type<tc>, window_params = [{transform_indices = @transform_0, window_bounds = array<i64: 2, 4, 256>}, {transform_indices = @transform_1, window_bounds = array<i64: 2, 4, 256>}, {transform_indices = @transform_2, window_bounds = array<i64: 2, 1, 256>}]} {
    %c0 = arith.constant 0 : index
    %c0_0 = arith.constant 0 : index
    %c0_1 = arith.constant 0 : index
    %0 = vector.load %arg2[%c0, %c0_0, %c0_1] : memref<2x4x256xf32, #tpu.memory_space<vmem>>, vector<2x4x256xf32>
    %c0_2 = arith.constant 0 : index
    %c0_3 = arith.constant 0 : index
    %c0_4 = arith.constant 0 : index
    %1 = vector.load %arg3[%c0_2, %c0_3, %c0_4] : memref<2x4x256xf32, #tpu.memory_space<vmem>>, vector<2x4x256xf32>
    %2 = arith.mulf %0, %1 : vector<2x4x256xf32>
    %cst = arith.constant dense<0.000000e+00> : vector<2x256xf32>
    %3 = vector.multi_reduction <add>, %2, %cst [1] : vector<2x4x256xf32> to vector<2x256xf32>
    %4 = vector.shape_cast %3 : vector<2x256xf32> to vector<2x1x256xf32>
    %5 = arith.mulf %0, %0 : vector<2x4x256xf32>
    %cst_5 = arith.constant dense<0.000000e+00> : vector<2x256xf32>
    %6 = vector.multi_reduction <add>, %5, %cst_5 [1] : vector<2x4x256xf32> to vector<2x256xf32>
    %7 = vector.shape_cast %6 : vector<2x256xf32> to vector<2x1x256xf32>
    %8 = arith.mulf %1, %1 : vector<2x4x256xf32>
    %cst_6 = arith.constant dense<0.000000e+00> : vector<2x256xf32>
    %9 = vector.multi_reduction <add>, %8, %cst_6 [1] : vector<2x4x256xf32> to vector<2x256xf32>
    %10 = vector.shape_cast %9 : vector<2x256xf32> to vector<2x1x256xf32>
    %cst_7 = arith.constant 9.99999993E-9 : f32
    %cst_8 = arith.constant 9.99999993E-9 : f32
    %11 = arith.mulf %cst_7, %cst_8 : f32
    %12 = arith.mulf %7, %10 : vector<2x1x256xf32>
    %13 = vector.broadcast %11 : f32 to vector<2x1x256xf32>
    %14 = arith.maximumf %12, %13 : vector<2x1x256xf32>
    %15 = math.rsqrt %14 : vector<2x1x256xf32>
    %16 = arith.mulf %4, %15 : vector<2x1x256xf32>
    %cst_9 = arith.constant 1.000000e+00 : f32
    %17 = vector.broadcast %cst_9 : f32 to vector<2x1x256xf32>
    %18 = arith.subf %17, %16 : vector<2x1x256xf32>
    %c0_10 = arith.constant 0 : index
    %c0_11 = arith.constant 0 : index
    %c0_12 = arith.constant 0 : index
    %19 = vector.load %arg4[%c0_10, %c0_11, %c0_12] : memref<2x1x256xf32, #tpu.memory_space<vmem>>, vector<2x1x256xf32>
    tpu.vector_store %arg4[%c0_10, %c0_11, %c0_12], %18 {strides = array<i32>} : memref<2x1x256xf32, #tpu.memory_space<vmem>>, vector<2x1x256xf32>,
    return
  }
  func.func @transform_0(%arg0: i32, %arg1: i32) -> (i32, i32, i32) {
    %c0_i32 = arith.constant 0 : i32
    %c0_i32_0 = arith.constant 0 : i32
    return %arg0, %c0_i32, %arg1 : i32, i32, i32
  }
  func.func @transform_1(%arg0: i32, %arg1: i32) -> (i32, i32, i32) {
    %c0_i32 = arith.constant 0 : i32
    %c0_i32_0 = arith.constant 0 : i32
    return %arg0, %c0_i32, %arg1 : i32, i32, i32
  }
  func.func @transform_2(%arg0: i32, %arg1: i32) -> (i32, i32, i32) {
    %c0_i32 = arith.constant 0 : i32
    %c0_i32_0 = arith.constant 0 : i32
    return %arg0, %c0_i32, %arg1 : i32, i32, i32
  }
}

</mosaic_0001>

<bundles_post_ra>
// kernel: tpu_custom_call.1
= control target key start
LH: loop header
LB: loop body
LE: loop exit
PB: predicated region body
PF: predicated region fallthrough
CT: control target
= control target key end

     0   :  { %7 = vsyncpa [#allocation3], 0  ;;  %s400_s0 = inlined_call_operand.hbm [shape: f32[2,4,256], index: 0, kind: input, shape index: {}]   ;;  %s401_s1 = inlined_call_operand.hbm [shape: f32[2,4,256], index: 1, kind: input, shape index: {}]   ;;  %s402_s2 = inlined_call_operand.hbm [shape: f32[2,1,256], index: 2, kind: output, shape index: {}]  }
   0x1   :  { %8 = vsyncpa [#allocation6], 0 }
   0x2   :  { %9 = vsyncpa [#allocation4], 0  ;;  %s321_s9 = smov [#allocation2]   ;;  %s249_s13 = scalar_lea.hbm %s400_s0, 256 }
   0x3   :  { %s15_s10 = sshll.u32 %s321_s9, 4  ;;  %p250_p0 = scmp.ne.s32.totalorder %s400_s0, %s249_s13  ;;  %s16_s10 = int_to_ptr.vmem [resolvable:$true] %s15_s10 }
   0x4   :  { %p253_p1 = scmp.lt.u32.totalorder %s249_s13, %s400_s0 }
   0x6   :  { %p255_p2 = pnand %p253_p1, %p250_p0 }
   0x8   :  { %258 = shalt.err (!%p255_p2)
}
   0x9   :  { %s259_s18 = scalar_lea.vmem %s16_s10, 256  ;;  %p264_p4 = scmp.lt.s32.totalorder %s16_s10, %s16_s10 }
   0xa   :  { %p260_p3 = scmp.ne.s32.totalorder %s16_s10, %s259_s18  ;;  %p265_p5 = scmp.lt.s32.totalorder %s259_s18, %s259_s18 }
   0xc   :  { %p266_p6 = por %p265_p5, %p264_p4 }
   0xe   :  { %p267_p7 = pnand %p266_p6, %p260_p3 }
  0x10   :  { %270 = shalt.err (!%p267_p7)
}
  0x11   :  { %s322_s19 = smov 128   ;;  %s323_s20 = smov 8  }
  0x12   :  { %21 = dma.hbm_to_vmem [thread:$0]  %s400_s0, 256, %s16_s10, [#allocation3], %s322_s19, %s322_s19, %s323_s20  }
  0x13   :  { %s324_s23 = smov [#allocation5]   ;;  %s271_s27 = scalar_lea.hbm %s401_s1, 256 }
  0x14   :  { %s27_s24 = sshll.u32 %s324_s23, 4  ;;  %p272_p8 = scmp.ne.s32.totalorder %s401_s1, %s271_s27  ;;  %s28_s24 = int_to_ptr.vmem [resolvable:$true] %s27_s24 }
  0x15   :  { %p275_p9 = scmp.lt.u32.totalorder %s271_s27, %s401_s1 }
  0x17   :  { %p277_p10 = pnand %p275_p9, %p272_p8 }
  0x19   :  { %280 = shalt.err (!%p277_p10)
}
  0x1a   :  { %s281_s4 = scalar_lea.vmem %s28_s24, 256  ;;  %p286_p12 = scmp.lt.s32.totalorder %s28_s24, %s28_s24 }
  0x1b   :  { %p282_p11 = scmp.ne.s32.totalorder %s28_s24, %s281_s4  ;;  %p287_p13 = scmp.lt.s32.totalorder %s281_s4, %s281_s4 }
  0x1d   :  { %p288_p0 = por %p287_p13, %p286_p12 }
  0x1f   :  { %p289_p1 = pnand %p288_p0, %p282_p11 }
  0x21   :  { %292 = shalt.err (!%p289_p1)
}
  0x22   :  { %33 = dma.hbm_to_vmem [thread:$0]  %s401_s1, 256, %s28_s24, [#allocation6], %s322_s19, %s322_s19, %s323_s20  }
  0x23   :  { %315 = dma.done.wait [#allocation3], 256  }
  0x24   :  { %316 = vsyncadd [#allocation3], 4294967040 }
  0x25   :  { %317 = dma.done.wait [#allocation6], 256  }
  0x26   :  { %318 = vsyncadd [#allocation6], 4294967040  ;;  %v40_v0 = vld [vmem:[#allocation2] sm:$0xff]  ;;  %v42_v1 = vld [vmem:[#allocation5] sm:$0xff]  ;;  %vm52_vm0 = vcmask 1043456   ;;  %s326_s1 = smov [#allocation7]  }
  0x27   :  { %v44_v2 = vmul.f32 %v42_v1, %v40_v0  ;;  %v81_v3 = vmul.f32 %v40_v0, %v40_v0  ;;  %v117_v4 = vmul.f32 %v42_v1, %v42_v1  ;;  %v41_v22 = vld [vmem:[#allocation2 + $0x8] sm:$0xff]  ;;  %v43_v23 = vld [vmem:[#allocation5 + $0x8] sm:$0xff]  ;;  %s220_s6 = sshll.u32 %s326_s1, 4  ;;  %s221_s6 = int_to_ptr.vmem [resolvable:$true] %s220_s6 }
  0x28   :  { %v45_v26 = vmul.f32 %v43_v23, %v41_v22  ;;  %v82_v35 = vmul.f32 %v41_v22, %v41_v22  ;;  %v118_v41 = vmul.f32 %v43_v23, %v43_v23  ;;  %s293_s7 = scalar_lea.vmem %s221_s6, 64  ;;  %p298_p3 = scmp.lt.s32.totalorder %s221_s6, %s221_s6 }
  0x29   :  { %v48_v5 = vcombine.high %v44_v2, %v44_v2  ;;  %v85_v6 = vcombine.high %v81_v3, %v81_v3  ;;  %v89_v7 = vsel %vm52_vm0, %v81_v3, 0.0  ;;  %v53_v8 = vsel %vm52_vm0, %v44_v2, 0.0  ;;  %p294_p2 = scmp.ne.s32.totalorder %s221_s6, %s293_s7  ;;  %p299_p4 = scmp.lt.s32.totalorder %s293_s7, %s293_s7 }
  0x2a   :  { %v90_v9 = vrot.slane %v89_v7, 4  ;;  %v121_v10 = vcombine.high %v117_v4, %v117_v4  ;;  %v125_v11 = vsel %vm52_vm0, %v117_v4, 0.0  ;;  %v54_v16 = vrot.slane %v53_v8, 4 }
  0x2b   :  { %v96_v12 = vsel %vm52_vm0, %v85_v6, 0.0  ;;  %v126_v13 = vrot.slane %v125_v11, 4  ;;  %v60_v19 = vsel %vm52_vm0, %v48_v5, 0.0  ;;  %v49_v38 = vcombine.high %v45_v26, %v45_v26  ;;  %p300_p5 = por %p299_p4, %p298_p3 }
  0x2c   :  { %v91_v14 = vadd.f32 %v90_v9, %v89_v7  ;;  %v97_v15 = vrot.slane %v96_v12, 4  ;;  %v132_v18 = vsel %vm52_vm0, %v121_v10, 0.0  ;;  %v55_v29 = vadd.f32 %v54_v16, %v53_v8 }
  0x2d   :  { %v127_v17 = vadd.f32 %v126_v13, %v125_v11  ;;  %v133_v25 = vrot.slane %v132_v18, 4  ;;  %v61_v30 = vrot.slane %v60_v19, 4  ;;  %v67_v46 = vsel %vm52_vm0, %v45_v26, 0.0  ;;  %p301_p6 = pnand %p300_p5, %p294_p2 }
  0x2e   :  { %v92_v20 = vrot.slane %v91_v14, 2  ;;  %v98_v21 = vadd.f32 %v97_v15, %v96_v12  ;;  %v56_v42 = vrot.slane %v55_v29, 2  ;;  %v86_v47 = vcombine.high %v82_v35, %v82_v35 }
  0x2f   :  { %v128_v24 = vrot.slane %v127_v17, 2  ;;  %v134_v32 = vadd.f32 %v133_v25, %v132_v18  ;;  %v62_v43 = vadd.f32 %v61_v30, %v60_v19  ;;  %v103_v48 = vsel %vm52_vm0, %v82_v35, 0.0 }
  0x30   :  { %v93_v27 = vadd.f32 %v92_v20, %v91_v14  ;;  %v99_v28 = vrot.slane %v98_v21, 2  ;;  %v74_v52 = vsel %vm52_vm0, %v49_v38, 0.0  ;;  %v104_v53 = vrot.slane %v103_v48, 4 }
  0x31   :  { %v129_v31 = vadd.f32 %v128_v24, %v127_v17  ;;  %v135_v37 = vrot.slane %v134_v32, 2  ;;  %v110_v54 = vsel %vm52_vm0, %v86_v47, 0.0  ;;  %v122_v55 = vcombine.high %v118_v41, %v118_v41 }
  0x32   :  { %v94_v33 = vrot.slane %v93_v27, 1  ;;  %v100_v34 = vadd.f32 %v99_v28, %v98_v21  ;;  %v139_v56 = vsel %vm52_vm0, %v118_v41, 0.0  ;;  %v57_v57 = vadd.f32 %v56_v42, %v55_v29 }
  0x33   :  { %v130_v36 = vrot.slane %v129_v31, 1  ;;  %v136_v45 = vadd.f32 %v135_v37, %v134_v32  ;;  %v63_v58 = vrot.slane %v62_v43, 2  ;;  %v105_v61 = vadd.f32 %v104_v53, %v103_v48 }
  0x34   :  { %v95_v39 = vadd.f32 %v94_v33, %v93_v27  ;;  %v101_v40 = vrot.slane %v100_v34, 1  ;;  %v111_v62 = vrot.slane %v110_v54, 4  ;;  %v140_v63 = vrot.slane %v139_v56, 4 }
  0x35   :  { %v131_v44 = vadd.f32 %v130_v36, %v129_v31  ;;  %v137_v50 = vrot.slane %v136_v45, 1  ;;  %v146_v0 = vsel %vm52_vm0, %v122_v55, 0.0  ;;  %v68_v3 = vrot.slane %v67_v46, 4 }
  0x36   :  { %v102_v49 = vadd.f32 %v101_v40, %v100_v34  ;;  %v147_v2 = vrot.slane %v146_v0, 4  ;;  %v106_v4 = vrot.slane %v105_v61, 2  ;;  %v112_v5 = vadd.f32 %v111_v62, %v110_v54 }
  0x37   :  { %v153_v51 = vmul.f32 %v131_v44, %v95_v39  ;;  %v138_v59 = vadd.f32 %v137_v50, %v136_v45  ;;  %v141_v6 = vadd.f32 %v140_v63, %v139_v56  ;;  %v58_v7 = vrot.slane %v57_v57, 1 }
  0x38   :  { %v75_v9 = vrot.slane %v74_v52, 4  ;;  %v148_v10 = vadd.f32 %v147_v2, %v146_v0  ;;  %v64_v11 = vadd.f32 %v63_v58, %v62_v43  ;;  %v107_v12 = vadd.f32 %v106_v4, %v105_v61 }
  0x39   :  { %v157_v60 = vmax.f32 %v153_v51, 1e-16  ;;  %v154_v1 = vmul.f32 %v138_v59, %v102_v49  ;;  %v113_v13 = vrot.slane %v112_v5, 2  ;;  %v142_v14 = vrot.slane %v141_v6, 2 }
  0x3a   :  { %v149_v15 = vrot.slane %v148_v10, 2  ;;  %v108_v16 = vrot.slane %v107_v12, 1  ;;  %v59_v19 = vadd.f32 %v58_v7, %v57_v57  ;;  %v69_v20 = vadd.f32 %v68_v3, %v67_v46 }
  0x3b   :  { %241 = vrsqrt.f32 %v157_v60  ;;  %v158_v8 = vmax.f32 %v154_v1, 1e-16  ;;  %v114_v17 = vadd.f32 %v113_v13, %v112_v5  ;;  %v143_v18 = vadd.f32 %v142_v14, %v141_v6 }
  0x3c   :  { %v76_v21 = vadd.f32 %v75_v9, %v74_v52  ;;  %v150_v22 = vadd.f32 %v149_v15, %v148_v10  ;;  %v65_v23 = vrot.slane %v64_v11, 1  ;;  %v109_v24 = vadd.f32 %v108_v16, %v107_v12 }
  0x3d   :  { %243 = vrsqrt.f32 %v158_v8  ;;  %v115_v25 = vrot.slane %v114_v17, 1  ;;  %v144_v26 = vrot.slane %v143_v18, 1  ;;  %v325_v28 = vmov 1966171168  }
  0x3e   :  { %v151_v27 = vrot.slane %v150_v22, 1  ;;  %v179_v29 = vunpack.c.l.s4 %v325_v28  ;;  %v181_v30 = vlaneseq  ;;  %v70_v34 = vrot.slane %v69_v20, 2 }
  0x3f   :  { %v116_v31 = vadd.f32 %v115_v25, %v114_v17  ;;  %v145_v32 = vadd.f32 %v144_v26, %v143_v18  ;;  %v66_v36 = vadd.f32 %v65_v23, %v64_v11  ;;  %v77_v38 = vrot.slane %v76_v21, 2 }
  0x40   :  { %v152_v35 = vadd.f32 %v151_v27, %v150_v22  ;;  %v180_v41 = vunpack.c.0.s8 %v179_v29  ;;  %v182_v42 = vshrl.u32 %v181_v30, 7  ;;  %v71_v45 = vadd.f32 %v70_v34, %v69_v20 }
  0x41   :  { %v155_v39 = vmul.f32 %v145_v32, %v109_v24  ;;  %v78_v49 = vadd.f32 %v77_v38, %v76_v21  ;;  %vm380_vm1 = vcmp.lt.s32.totalorder %v181_v30, 256 }
  0x42   :  { %v156_v40 = vmul.f32 %v152_v35, %v116_v31  ;;  %v183_v51 = vsub.s32 %v180_v41, %v182_v42  ;;  %v72_v52 = vrot.slane %v71_v45, 1 }
  0x43   :  { %v159_v43 = vmax.f32 %v155_v39, 1e-16  ;;  %v79_v54 = vrot.slane %v78_v49, 1 }
  0x44   :  { %v160_v46 = vmax.f32 %v156_v40, 1e-16  ;;  %v73_v57 = vadd.f32 %v72_v52, %v71_v45 }
  0x45   :  { %v242_v33 = vpop.eup %241  ;;  %245 = vrsqrt.f32 %v159_v43  ;;  %v80_v59 = vadd.f32 %v79_v54, %v78_v49 }
  0x46   :  { %v165_v37 = vmul.f32 %v242_v33, %v59_v19  ;;  %247 = vrsqrt.f32 %v160_v46 }
  0x47   :  { %v244_v44 = vpop.eup %243 }
  0x48   :  { %v166_v47 = vmul.f32 %v244_v44, %v66_v36  ;;  %v169_v48 = vsub.f32 1.0, %v165_v37 }
  0x4a   :  { %v170_v50 = vsub.f32 1.0, %v166_v47 }
  0x4c   :  { %v177_v53 = vcombine.low %v169_v48, %v170_v50 }
  0x4e   :  { %v184_v55 = vrot.slane %v177_v53, %v183_v51 }
  0x4f   :  { %v246_v60 = vpop.eup %245 }
  0x50   :  { %v191_v58 = vrot.slane %v184_v55, %v183_v51  ;;  %v248_v61 = vpop.eup %247  ;;  %v167_v62 = vmul.f32 %v246_v60, %v73_v57 }
  0x51   :  { %v168_v63 = vmul.f32 %v248_v61, %v80_v59 }
  0x52   :  { %213 = vst.msk [vmem:[#allocation7] sm:$0x3] %vm380_vm1, %v191_v58  ;;  %v171_v0 = vsub.f32 1.0, %v167_v62 }
  0x53   :  { %v172_v1 = vsub.f32 1.0, %v168_v63 }
  0x55   :  { %v192_v2 = vcombine.low %v171_v0, %v172_v1 }
  0x57   :  { %v199_v3 = vrot.slane %v192_v2, %v183_v51 }
  0x59   :  { %v206_v4 = vrot.slane %v199_v3, %v183_v51 }
  0x5b   :  { %214 = vst.msk [vmem:[#allocation7 + $0x2] sm:$0x3] %vm380_vm1, %v206_v4 }
  0x5c   :  { %304 = shalt.err (!%p301_p6)
}
  0x5d   :  { %s305_s10 = scalar_lea.hbm %s402_s2, 64 }
  0x5e   :  { %p306_p7 = scmp.ne.s32.totalorder %s402_s2, %s305_s10  ;;  %p309_p8 = scmp.lt.u32.totalorder %s305_s10, %s402_s2 }
  0x60   :  { %p311_p9 = pnand %p309_p8, %p306_p7 }
  0x62   :  { %314 = shalt.err (!%p311_p9)
}
  0x63   :  { %s327_s15 = smov 32   ;;  %s328_s16 = smov 2  }
  0x64   :  { %226 = dma.vmem_to_hbm [thread:$0]  %s221_s6, 64, %s402_s2, [#allocation4], %s327_s15, %s327_s15, %s328_s16  }
  0x65   :  { %319 = dma.done.wait [#allocation4], 64  }
  0x66   :  { %320 = vsyncadd [#allocation4], 4294967232 }
  0x67   :  { %230 = vsyncpa [#allocation3], 1 }
  0x68   :  { %231 = vsyncpa [#allocation6], 1 }
  0x69   :  { %232 = vsyncpa [#allocation4], 1 }

</bundles_post_ra>
